<compile_context>
chip_gen: v7x
topology: tpu7x:2x2x1
jax: 0.10.0
libtpu: 0.0.40
codegen_flags: <defaults>
</compile_context>

<pallas_src>
import jax
import jax.numpy as jnp
from jax import lax
from jax.experimental import pallas as pl
from jax.experimental.pallas import tpu as pltpu

_LANE_CHUNK = 512  # lanes of f32 partial accumulator (4 vregs at 8 sublanes)


def _lane_dot(x_ref, w_ref):
    """sum_lanes(x * w) -> (Bt, 1) f32, with a bounded (Bt, <=512) live partial."""
    bt, nf = x_ref.shape
    if nf <= _LANE_CHUNK:
        prod = x_ref[...].astype(jnp.float32) * w_ref[...].astype(jnp.float32)
        return jnp.sum(prod, axis=-1, keepdims=True)

    n_full = nf // _LANE_CHUNK

    def body(i, acc):
        start = pl.multiple_of(i * _LANE_CHUNK, _LANE_CHUNK)
        xs = x_ref[:, pl.ds(start, _LANE_CHUNK)].astype(jnp.float32)
        ws = w_ref[:, pl.ds(start, _LANE_CHUNK)].astype(jnp.float32)
        return acc + xs * ws

    acc = lax.fori_loop(0, n_full, body,
                        jnp.zeros((bt, _LANE_CHUNK), jnp.float32),
                        unroll=(n_full <= 8))
    out = jnp.sum(acc, axis=-1, keepdims=True)

    tail = nf - n_full * _LANE_CHUNK
    if tail:
        xs = x_ref[:, pl.ds(n_full * _LANE_CHUNK, tail)].astype(jnp.float32)
        ws = w_ref[:, pl.ds(n_full * _LANE_CHUNK, tail)].astype(jnp.float32)
        out = out + jnp.sum(xs * ws, axis=-1, keepdims=True)
    return out


def _linear_cat_sum_kernel(x1_ref, x2_ref, w1_ref, w2_ref, b_ref, o_ref):
    # x1_ref: (Bt, N*F1) VMEM   x2_ref: (Bt, N*F2) VMEM
    # w1_ref: (1, N*F1)  VMEM   w2_ref: (1, N*F2)  VMEM   (pre-tiled weight rows)
    # b_ref : (1,) SMEM holding N * bias
    # o_ref : (Bt, 1)    VMEM
    acc = _lane_dot(x1_ref, w1_ref) + _lane_dot(x2_ref, w2_ref)   # (Bt, 1) f32
    o_ref[...] = (acc + b_ref[0]).astype(o_ref.dtype)


def basic_linear_model5_forward(input1, input2, weight, bias):
    """input1: (B, N, F1), input2: (B, N, F2), weight: (1, F1+F2), bias: (1,).
    Returns (B, 1), matching PyTorch Linear(...).sum(1)."""
    B, N, f1 = input1.shape
    _, _, f2 = input2.shape
    nf1, nf2 = N * f1, N * f2

    # Free contiguous reshapes (no transpose, no extra HBM pass).
    x1 = input1.reshape(B, nf1)
    x2 = input2.reshape(B, nf2)

    w = weight.reshape(-1).astype(jnp.float32)                       # (F1+F2,)
    w1_row = jnp.tile(w[:f1], N).reshape(1, nf1)                     # (1, N*F1)
    w2_row = jnp.tile(w[f1:f1 + f2], N).reshape(1, nf2)              # (1, N*F2)
    b_tot = jnp.float32(N) * bias.reshape(-1).astype(jnp.float32)    # (1,) = N*bias

    # Batch (sublane) tile sized so double-buffered inputs stay < ~4 MiB
    # (safe under v5e's 16 MiB default scoped VMEM and v7x's 64 MiB physical).
    per_row_bytes = 4 * (nf1 + nf2)
    max_rows = max(8, (8 * 1024 * 1024) // (4 * per_row_bytes))
    max_rows = (max_rows // 8) * 8
    tile_b = min(512, max_rows)
    if B <= tile_b:
        tile_b = B                       # single full-array block
    grid = (pl.cdiv(B, tile_b),)

    tile_vmem_bytes = 4 * (2 * 2 * tile_b * (nf1 + nf2)   # double-buffered x1,x2
                           + (nf1 + nf2)                  # weight rows
                           + 2 * tile_b)                  # double-buffered out
    vmem_limit = int(min(32 * 1024 * 1024,
                         max(2 * tile_vmem_bytes, 16 * 1024 * 1024)))

    cost = pl.CostEstimate(
        flops=2 * (f1 + f2) * B * N,
        transcendentals=0,
        bytes_accessed=4 * ((f1 + f2) * B * N + B + (nf1 + nf2) + 1),
    )

    out = pl.pallas_call(
        _linear_cat_sum_kernel,
        out_shape=jax.ShapeDtypeStruct((B, 1), input1.dtype),
        grid=grid,
        in_specs=[
            pl.BlockSpec((tile_b, nf1), lambda i: (i, 0)),
            pl.BlockSpec((tile_b, nf2), lambda i: (i, 0)),
            pl.BlockSpec((1, nf1), lambda i: (0, 0)),
            pl.BlockSpec((1, nf2), lambda i: (0, 0)),
            pl.BlockSpec(memory_space=pltpu.MemorySpace.SMEM),
        ],
        out_specs=pl.BlockSpec((tile_b, 1), lambda i: (i, 0)),
        compiler_params=pltpu.CompilerParams(
            dimension_semantics=("parallel",),
            vmem_limit_bytes=vmem_limit,
        ),
        cost_estimate=cost,
    )(x1, x2, w1_row, w2_row, b_tot)

    return out


def _reference(input1, input2, weight, bias):
    return (jnp.concatenate((input1, input2), axis=-1) @ weight.T + bias).sum(axis=1)


if __name__ == "__main__":
    key = jax.random.PRNGKey(0)
    k1, k2, kw, kb, k3, k4 = jax.random.split(key, 6)

    # nn.Linear(7, 1)-style deterministic init: U(-1/sqrt(7), 1/sqrt(7)).
    bound = 1.0 / (7.0 ** 0.5)
    weight = jax.random.uniform(kw, (1, 7), jnp.float32, -bound, bound)
    bias = jax.random.uniform(kb, (1,), jnp.float32, -bound, bound)

    # Small shapes implied by the module (concat feature dim must be 7).
    B, N, F1, F2 = 2, 8, 4, 3
    input1 = jax.random.normal(k1, (B, N, F1), dtype=jnp.float32)
    input2 = jax.random.normal(k2, (B, N, F2), dtype=jnp.float32)

    out = basic_linear_model5_forward(input1, input2, weight, bias)
    out = jax.block_until_ready(out)
    ref = _reference(input1, input2, weight, bias)
    assert out.shape == (B, 1), out.shape
    assert jnp.allclose(out, ref, atol=1e-5, rtol=1e-5), (out, ref)

    # Secondary check exercising the gridded (pipelined) batch path and the
    # chunked lane reduction.
    B2, N2 = 1024, 256
    input1b = jax.random.normal(k3, (B2, N2, F1), dtype=jnp.float32)
    input2b = jax.random.normal(k4, (B2, N2, F2), dtype=jnp.float32)
    out2 = jax.block_until_ready(
        basic_linear_model5_forward(input1b, input2b, weight, bias))
    ref2 = _reference(input1b, input2b, weight, bias)
    assert out2.shape == (B2, 1), out2.shape
    assert jnp.allclose(out2, ref2, atol=2e-4, rtol=2e-4)

    print("KERNEL_OK")
</pallas_src>

<mosaic_0001>
module attributes {stable_mosaic.version = 11 : i64} {
  func.func @_linear_cat_sum_kernel(%arg0: i32, %arg1: memref<2x32xf32, #tpu.memory_space<vmem>>, %arg2: memref<2x24xf32, #tpu.memory_space<vmem>>, %arg3: memref<1x32xf32, #tpu.memory_space<vmem>>, %arg4: memref<1x24xf32, #tpu.memory_space<vmem>>, %arg5: memref<1xf32, #tpu.memory_space<smem>>, %arg6: memref<2x1xf32, #tpu.memory_space<vmem>>) attributes {dimension_semantics = [#tpu.dimension_semantics<parallel>], iteration_bounds = array<i64: 1>, scalar_prefetch = 0 : i64, scratch_operands = 0 : i64, tpu.core_type = #tpu.core_type<tc>, window_params = [{transform_indices = @transform_0, window_bounds = array<i64: 2, 32>}, {transform_indices = @transform_1, window_bounds = array<i64: 2, 24>}, {pipeline_mode = #tpu.pipeline_mode<synchronous>, transform_indices = @transform_2, window_bounds = array<i64: 1, 32>}, {pipeline_mode = #tpu.pipeline_mode<synchronous>, transform_indices = @transform_3, window_bounds = array<i64: 1, 24>}, {transform_indices = @transform_4, window_bounds = array<i64: 1>}, {transform_indices = @transform_5, window_bounds = array<i64: 2, 1>}]} {
    %c0 = arith.constant 0 : index
    %c0_0 = arith.constant 0 : index
    %0 = vector.load %arg1[%c0, %c0_0] : memref<2x32xf32, #tpu.memory_space<vmem>>, vector<2x32xf32>
    %c0_1 = arith.constant 0 : index
    %c0_2 = arith.constant 0 : index
    %1 = vector.load %arg3[%c0_1, %c0_2] : memref<1x32xf32, #tpu.memory_space<vmem>>, vector<1x32xf32>
    %2 = vector.broadcast %1 : vector<1x32xf32> to vector<2x32xf32>
    %3 = arith.mulf %0, %2 : vector<2x32xf32>
    %cst = arith.constant dense<0.000000e+00> : vector<2xf32>
    %4 = vector.multi_reduction <add>, %3, %cst [1] : vector<2x32xf32> to vector<2xf32>
    %5 = vector.shape_cast %4 : vector<2xf32> to vector<2x1xf32>
    %c0_3 = arith.constant 0 : index
    %c0_4 = arith.constant 0 : index
    %6 = vector.load %arg2[%c0_3, %c0_4] : memref<2x24xf32, #tpu.memory_space<vmem>>, vector<2x24xf32>
    %c0_5 = arith.constant 0 : index
    %c0_6 = arith.constant 0 : index
    %7 = vector.load %arg4[%c0_5, %c0_6] : memref<1x24xf32, #tpu.memory_space<vmem>>, vector<1x24xf32>
    %8 = vector.broadcast %7 : vector<1x24xf32> to vector<2x24xf32>
    %9 = arith.mulf %6, %8 : vector<2x24xf32>
    %cst_7 = arith.constant dense<0.000000e+00> : vector<2xf32>
    %10 = vector.multi_reduction <add>, %9, %cst_7 [1] : vector<2x24xf32> to vector<2xf32>
    %11 = vector.shape_cast %10 : vector<2xf32> to vector<2x1xf32>
    %12 = arith.addf %5, %11 : vector<2x1xf32>
    %c0_8 = arith.constant 0 : index
    %13 = memref.load %arg5[%c0_8] : memref<1xf32, #tpu.memory_space<smem>>
    %14 = vector.broadcast %13 : f32 to vector<2x1xf32>
    %15 = arith.addf %12, %14 : vector<2x1xf32>
    %c0_9 = arith.constant 0 : index
    %c0_10 = arith.constant 0 : index
    %16 = vector.load %arg6[%c0_9, %c0_10] : memref<2x1xf32, #tpu.memory_space<vmem>>, vector<2x1xf32>
    tpu.vector_store %arg6[%c0_9, %c0_10], %15 {strides = array<i32>} : memref<2x1xf32, #tpu.memory_space<vmem>>, vector<2x1xf32>,
    return
  }
  func.func @transform_0(%arg0: i32) -> (i32, i32) {
    %c0_i32 = arith.constant 0 : i32
    %c0_i32_0 = arith.constant 0 : i32
    return %arg0, %c0_i32 : i32, i32
  }
  func.func @transform_1(%arg0: i32) -> (i32, i32) {
    %c0_i32 = arith.constant 0 : i32
    %c0_i32_0 = arith.constant 0 : i32
    return %arg0, %c0_i32 : i32, i32
  }
  func.func @transform_2(%arg0: i32) -> (i32, i32) {
    %c0_i32 = arith.constant 0 : i32
    %c0_i32_0 = arith.constant 0 : i32
    %c0_i32_1 = arith.constant 0 : i32
    return %c0_i32, %c0_i32_0 : i32, i32
  }
  func.func @transform_3(%arg0: i32) -> (i32, i32) {
    %c0_i32 = arith.constant 0 : i32
    %c0_i32_0 = arith.constant 0 : i32
    %c0_i32_1 = arith.constant 0 : i32
    return %c0_i32, %c0_i32_0 : i32, i32
  }
  func.func @transform_4(%arg0: i32) -> i32 {
    %c0_i32 = arith.constant 0 : i32
    %c0_i32_0 = arith.constant 0 : i32
    return %c0_i32 : i32
  }
  func.func @transform_5(%arg0: i32) -> (i32, i32) {
    %c0_i32 = arith.constant 0 : i32
    %c0_i32_0 = arith.constant 0 : i32
    return %arg0, %c0_i32 : i32, i32
  }
}

</mosaic_0001>

<bundles_post_ra>
// kernel: tpu_custom_call.1
= control target key start
LH: loop header
LB: loop body
LE: loop exit
PB: predicated region body
PF: predicated region fallthrough
CT: control target
= control target key end

     0   :  { %vm30_vm0 = vcmask 254976   ;;  %vm43_vm1 = vcmask 189440   ;;  %vm51_vm2 = vcmask 1024   ;;  %s107_s0 = inlined_call_operand.vmem [shape: f32[2,32], index: 0, kind: input, shape index: {}]   ;;  %s108_s2 = inlined_call_operand.vmem [shape: f32[1,32], index: 2, kind: input, shape index: {}]   ;;  %s109_s1 = inlined_call_operand.vmem [shape: f32[2,24], index: 1, kind: input, shape index: {}]   ;;  %s110_s3 = inlined_call_operand.vmem [shape: f32[1,24], index: 3, kind: input, shape index: {}]   ;;  %s111_s4 = inlined_call_operand.<no memory space> [shape: f32[1], index: 4, kind: input, shape index: {}]   ;;  %s112_s5 = inlined_call_operand.vmem [shape: f32[2,1], index: 5, kind: output, shape index: {}]  }
   0x1   :  { %v21_v0 = vld [vmem:[%s107_s0] sm:$0x3]  ;;  %v49_v9 = vstv %s111_s4 }
   0x2   :  { %v57_v1 = vld [vmem:[%s108_s2] ss:$0 sm:$0xff] }
   0x3   :  { %v34_v2 = vld [vmem:[%s109_s1] sm:$0x3]  ;;  %v29_v3 = vmul.f32 %v57_v1, %v21_v0 }
   0x4   :  { %v58_v4 = vld [vmem:[%s110_s3] ss:$0 sm:$0xff] }
   0x5   :  { %v42_v5 = vmul.f32 %v58_v4, %v34_v2  ;;  %v31_v6 = vsel %vm30_vm0, %v29_v3, 0.0 }
   0x6   :  { %32 = vadd.xlane.f32.xlu0 %v31_v6 }
   0x7   :  { %v44_v7 = vsel %vm43_vm1, %v42_v5, 0.0 }
   0xa   :  { %45 = vadd.xlane.f32.xlu0 %v44_v7 }
  0x93   :  { %v33_v8 = vpop.xlane.xlu0 %32 }
  0x97   :  { %v46_v10 = vpop.xlane.xlu0 %45 }
  0x98   :  { %v47_v11 = vadd.f32 %v46_v10, %v33_v8 }
  0x9a   :  { %v50_v12 = vadd.f32 %v49_v9, %v47_v11 }
  0x9c   :  { %52 = vst.msk [vmem:[%s112_s5] sm:$0x3] %vm51_vm2, %v50_v12 }

</bundles_post_ra>
